<compile_context>
chip_gen: v5e
topology: v5e:2x2
jax: 0.10.0
libtpu: 0.0.40
codegen_flags: <defaults>
</compile_context>

<pallas_src>
import functools

import jax
import jax.numpy as jnp
from jax.experimental import pallas as pl
from jax.experimental.pallas import tpu as pltpu

ALPHA = 2.0
BETA = 4.0
EPS = 1e-7

LANES = 128           # lane width (last dim of every block)
MAX_TILE_ROWS = 1024  # sublane rows per grid step (512 KiB f32 / input / step)
NUM_CORES = 2         # leading 'parallel' axis; 2 TCs on v7x, harmless elsewhere
ACC_ROWS = 8          # resident accumulator slab = one (8, 128) vreg per core


def _round_up(x, m):
    return (x + m - 1) // m * m


def _power(x, p):
    """Integer powers via exponentiation-by-squaring (no multiply-by-one)."""
    p = float(p)
    if p.is_integer() and 1 <= int(p) <= 16:
        n = int(p)
        result = None
        base = x
        while n:
            if n & 1:
                result = base if result is None else result * base
            n >>= 1
            if n:
                base = base * base
        return result
    return jnp.power(x, p)


def _focal_loss_kernel(pred_ref, gt_ref, mask_ref, loss_ref, msum_ref,
                       *, alpha, beta, eps):
    k = pl.program_id(1)  # reduction axis

    @pl.when(k == 0)
    def _init():
        loss_ref[...] = jnp.zeros_like(loss_ref)
        msum_ref[...] = jnp.zeros_like(msum_ref)

    pred = pred_ref[...]
    gt = gt_ref[...]
    mask = mask_ref[...].astype(jnp.float32)  # int8/f32 -> f32 (cheap VPU unpack)

    pos_loss = jnp.log(pred + eps) * _power(1.0 - pred, alpha) * mask
    neg_loss = (jnp.log(1.0 - pred + eps) * _power(pred, alpha)
                * _power(1.0 - gt, beta) * (1.0 - mask))
    loss = pos_loss + neg_loss  # pos/neg are only ever summed downstream

    # Fold the (tile_rows, 128) tile into one (8, 128) slab (pure VALU adds,
    # reshape stays inside native (8, 128) tiles) and accumulate in place.
    g = loss.shape[0] // ACC_ROWS
    loss_ref[...] += jnp.sum(loss.reshape(g, ACC_ROWS, LANES), axis=0)
    msum_ref[...] += jnp.sum(mask.reshape(g, ACC_ROWS, LANES), axis=0)


def focal_loss(pred, gt, mask, alpha=ALPHA, beta=BETA, eps=EPS,
               compact_mask=True):
    """pred, gt, mask: (B, C, H, W) -> scalar float32 (matches FocalLoss.forward).

    compact_mask=True streams the (binary) mask as int8 to cut HBM traffic;
    set False if the mask is not exactly 0/1 valued.
    """
    B = pred.shape[0]
    total = int(pred.size)

    pred1 = pred.reshape(-1).astype(jnp.float32)
    gt1 = gt.reshape(-1).astype(jnp.float32)
    # TODO(synk): gt could be streamed as bf16 for ~17% fewer bytes if the
    # small accuracy loss is acceptable; kept f32 to preserve exact semantics.
    mask1 = (mask.reshape(-1).astype(jnp.int8) if compact_mask
             else mask.reshape(-1).astype(jnp.float32))

    rows = (total + LANES - 1) // LANES
    # tile_rows multiple of 32 so int8 blocks satisfy native (32, 128) tiling.
    tile_rows = min(MAX_TILE_ROWS,
                    _round_up((rows + NUM_CORES - 1) // NUM_CORES, 32))
    rows_padded = _round_up(rows, NUM_CORES * tile_rows)
    steps_per_core = rows_padded // (NUM_CORES * tile_rows)
    pad = rows_padded * LANES - total

    # Padding with pred=0, mask=0 contributes exactly zero to both loss terms
    # (pred**alpha == 0 kills the neg term, mask == 0 kills the pos term) and
    # zero to the positive count, so semantics are unchanged.
    pred2 = jnp.pad(pred1, (0, pad)).reshape(rows_padded, LANES)
    gt2 = jnp.pad(gt1, (0, pad)).reshape(rows_padded, LANES)
    mask2 = jnp.pad(mask1, (0, pad)).reshape(rows_padded, LANES)

    in_spec = pl.BlockSpec((tile_rows, LANES),
                           lambda p, k: (p * steps_per_core + k, 0))
    # Per-core resident accumulator slab (revisited across the k axis).
    acc_spec = pl.BlockSpec((ACC_ROWS, LANES), lambda p, k: (p, 0))

    kernel = functools.partial(_focal_loss_kernel, alpha=alpha, beta=beta, eps=eps)

    loss_acc, msum_acc = pl.pallas_call(
        kernel,
        out_shape=(
            jax.ShapeDtypeStruct((NUM_CORES * ACC_ROWS, LANES), jnp.float32),
            jax.ShapeDtypeStruct((NUM_CORES * ACC_ROWS, LANES), jnp.float32),
        ),
        grid_spec=pltpu.PrefetchScalarGridSpec(
            num_scalar_prefetch=0,
            grid=(NUM_CORES, steps_per_core),
            in_specs=[in_spec, in_spec, in_spec],
            out_specs=[acc_spec, acc_spec],
        ),
        compiler_params=pltpu.CompilerParams(
            dimension_semantics=("parallel", "arbitrary"),
        ),
        # NOTE: pipeline_mode=pl.Buffered(3) on in_spec is a possible extra
        # few-% knob if DMA issue latency is still exposed; sweep if needed.
    )(pred2, gt2, mask2)

    # Scalar glue: sum(dim=[1,2,3]).mean() over batch == grand total / B.
    loss_sum = jnp.sum(loss_acc)                      # total pos_loss + neg_loss
    num_pos = jnp.clip(jnp.sum(msum_acc), 1.0, 1e30)  # clamp(1, 1e30)
    return -(loss_sum / B) / num_pos


def focal_loss_ref(pred, gt, mask, alpha=ALPHA, beta=BETA, eps=EPS):
    """Pure-JAX reference mirroring the PyTorch forward."""
    neg_inds = jnp.ones_like(mask) - mask
    neg_weights = (1.0 - gt) ** beta
    pos_loss = jnp.log(pred + eps) * (1.0 - pred) ** alpha * mask
    neg_loss = jnp.log(1.0 - pred + eps) * pred ** alpha * neg_weights * neg_inds
    pos_loss = pos_loss.sum(axis=(1, 2, 3)).mean()
    neg_loss = neg_loss.sum(axis=(1, 2, 3)).mean()
    num_pos = jnp.clip(mask.sum(), 1.0, 1e30)
    return -(pos_loss + neg_loss) / num_pos


if __name__ == "__main__":
    key = jax.random.PRNGKey(0)
    k1, k2, k3 = jax.random.split(key, 3)

    B, C, H, W = 2, 4, 16, 16
    # pred: probabilities in (0,1); gt: heatmap in [0,1]; mask: binary peaks.
    pred = jax.nn.sigmoid(jax.random.normal(k1, (B, C, H, W), jnp.float32))
    gt = jax.random.uniform(k2, (B, C, H, W), jnp.float32)
    mask = (jax.random.uniform(k3, (B, C, H, W), jnp.float32) > 0.95).astype(jnp.float32)

    ref = jax.block_until_ready(focal_loss_ref(pred, gt, mask))

    out = jax.block_until_ready(focal_loss(pred, gt, mask))           # int8 mask path
    out_f32 = jax.block_until_ready(focal_loss(pred, gt, mask,
                                               compact_mask=False))   # f32 mask path

    assert jnp.isfinite(out), "non-finite kernel output"
    assert jnp.allclose(out, ref, rtol=1e-4, atol=1e-6), (out, ref)
    assert jnp.allclose(out_f32, ref, rtol=1e-4, atol=1e-6), (out_f32, ref)
    print("KERNEL_OK")
</pallas_src>

<mosaic_0001>
module attributes {stable_mosaic.version = 11 : i64} {
  func.func @_focal_loss_kernel(%arg0: i32, %arg1: i32, %arg2: memref<32x128xf32, #tpu.memory_space<vmem>>, %arg3: memref<32x128xf32, #tpu.memory_space<vmem>>, %arg4: memref<32x128xi8, #tpu.memory_space<vmem>>, %arg5: memref<8x128xf32, #tpu.memory_space<vmem>>, %arg6: memref<8x128xf32, #tpu.memory_space<vmem>>) attributes {dimension_semantics = [#tpu.dimension_semantics<parallel>, #tpu.dimension_semantics<arbitrary>], iteration_bounds = array<i64: 2, 1>, scalar_prefetch = 0 : i64, scratch_operands = 0 : i64, tpu.core_type = #tpu.core_type<tc>, window_params = [{transform_indices = @transform_0, window_bounds = array<i64: 32, 128>}, {transform_indices = @transform_1, window_bounds = array<i64: 32, 128>}, {transform_indices = @transform_2, window_bounds = array<i64: 32, 128>}, {transform_indices = @transform_3, window_bounds = array<i64: 8, 128>}, {transform_indices = @transform_4, window_bounds = array<i64: 8, 128>}]} {
    %c0_i32 = arith.constant 0 : i32
    %0 = arith.cmpi eq, %arg1, %c0_i32 : i32
    %1 = arith.extui %0 : i1 to i32
    %c0_i32_0 = arith.constant 0 : i32
    %2 = arith.cmpi ne, %1, %c0_i32_0 : i32
    scf.if %2 {
      %cst_21 = arith.constant 0.000000e+00 : f32
      %41 = vector.broadcast %cst_21 : f32 to vector<8x128xf32>
      %c0_22 = arith.constant 0 : index
      %c0_23 = arith.constant 0 : index
      %42 = vector.load %arg5[%c0_22, %c0_23] : memref<8x128xf32, #tpu.memory_space<vmem>>, vector<8x128xf32>
      tpu.vector_store %arg5[%c0_22, %c0_23], %41 {strides = array<i32>} : memref<8x128xf32, #tpu.memory_space<vmem>>, vector<8x128xf32>,
      %cst_24 = arith.constant 0.000000e+00 : f32
      %43 = vector.broadcast %cst_24 : f32 to vector<8x128xf32>
      %c0_25 = arith.constant 0 : index
      %c0_26 = arith.constant 0 : index
      %44 = vector.load %arg6[%c0_25, %c0_26] : memref<8x128xf32, #tpu.memory_space<vmem>>, vector<8x128xf32>
      tpu.vector_store %arg6[%c0_25, %c0_26], %43 {strides = array<i32>} : memref<8x128xf32, #tpu.memory_space<vmem>>, vector<8x128xf32>,
    } else {
    }
    %c0 = arith.constant 0 : index
    %c0_1 = arith.constant 0 : index
    %3 = vector.load %arg2[%c0, %c0_1] : memref<32x128xf32, #tpu.memory_space<vmem>>, vector<32x128xf32>
    %c0_2 = arith.constant 0 : index
    %c0_3 = arith.constant 0 : index
    %4 = vector.load %arg3[%c0_2, %c0_3] : memref<32x128xf32, #tpu.memory_space<vmem>>, vector<32x128xf32>
    %c0_4 = arith.constant 0 : index
    %c0_5 = arith.constant 0 : index
    %5 = vector.load %arg4[%c0_4, %c0_5] : memref<32x128xi8, #tpu.memory_space<vmem>>, vector<32x128xi8>
    %6 = arith.sitofp %5 : vector<32x128xi8> to vector<32x128xf32>
    %cst = arith.constant 1.000000e-07 : f32
    %7 = vector.broadcast %cst : f32 to vector<32x128xf32>
    %8 = arith.addf %3, %7 : vector<32x128xf32>
    %9 = math.log %8 : vector<32x128xf32>
    %cst_6 = arith.constant 1.000000e+00 : f32
    %10 = vector.broadcast %cst_6 : f32 to vector<32x128xf32>
    %11 = arith.subf %10, %3 : vector<32x128xf32>
    %12 = arith.mulf %11, %11 : vector<32x128xf32>
    %13 = arith.mulf %9, %12 : vector<32x128xf32>
    %14 = arith.mulf %13, %6 : vector<32x128xf32>
    %cst_7 = arith.constant 1.000000e+00 : f32
    %15 = vector.broadcast %cst_7 : f32 to vector<32x128xf32>
    %16 = arith.subf %15, %3 : vector<32x128xf32>
    %cst_8 = arith.constant 1.000000e-07 : f32
    %17 = vector.broadcast %cst_8 : f32 to vector<32x128xf32>
    %18 = arith.addf %16, %17 : vector<32x128xf32>
    %19 = math.log %18 : vector<32x128xf32>
    %20 = arith.mulf %3, %3 : vector<32x128xf32>
    %21 = arith.mulf %19, %20 : vector<32x128xf32>
    %cst_9 = arith.constant 1.000000e+00 : f32
    %22 = vector.broadcast %cst_9 : f32 to vector<32x128xf32>
    %23 = arith.subf %22, %4 : vector<32x128xf32>
    %24 = arith.mulf %23, %23 : vector<32x128xf32>
    %25 = arith.mulf %24, %24 : vector<32x128xf32>
    %26 = arith.mulf %21, %25 : vector<32x128xf32>
    %cst_10 = arith.constant 1.000000e+00 : f32
    %27 = vector.broadcast %cst_10 : f32 to vector<32x128xf32>
    %28 = arith.subf %27, %6 : vector<32x128xf32>
    %29 = arith.mulf %26, %28 : vector<32x128xf32>
    %30 = arith.addf %14, %29 : vector<32x128xf32>
    %c0_11 = arith.constant 0 : index
    %c0_12 = arith.constant 0 : index
    %31 = vector.load %arg5[%c0_11, %c0_12] : memref<8x128xf32, #tpu.memory_space<vmem>>, vector<8x128xf32>
    %32 = vector.shape_cast %30 : vector<32x128xf32> to vector<4x8x128xf32>
    %cst_13 = arith.constant dense<0.000000e+00> : vector<8x128xf32>
    %33 = vector.multi_reduction <add>, %32, %cst_13 [0] : vector<4x8x128xf32> to vector<8x128xf32>
    %34 = arith.addf %31, %33 : vector<8x128xf32>
    %c0_14 = arith.constant 0 : index
    %c0_15 = arith.constant 0 : index
    %35 = vector.load %arg5[%c0_14, %c0_15] : memref<8x128xf32, #tpu.memory_space<vmem>>, vector<8x128xf32>
    tpu.vector_store %arg5[%c0_14, %c0_15], %34 {strides = array<i32>} : memref<8x128xf32, #tpu.memory_space<vmem>>, vector<8x128xf32>,
    %c0_16 = arith.constant 0 : index
    %c0_17 = arith.constant 0 : index
    %36 = vector.load %arg6[%c0_16, %c0_17] : memref<8x128xf32, #tpu.memory_space<vmem>>, vector<8x128xf32>
    %37 = vector.shape_cast %6 : vector<32x128xf32> to vector<4x8x128xf32>
    %cst_18 = arith.constant dense<0.000000e+00> : vector<8x128xf32>
    %38 = vector.multi_reduction <add>, %37, %cst_18 [0] : vector<4x8x128xf32> to vector<8x128xf32>
    %39 = arith.addf %36, %38 : vector<8x128xf32>
    %c0_19 = arith.constant 0 : index
    %c0_20 = arith.constant 0 : index
    %40 = vector.load %arg6[%c0_19, %c0_20] : memref<8x128xf32, #tpu.memory_space<vmem>>, vector<8x128xf32>
    tpu.vector_store %arg6[%c0_19, %c0_20], %39 {strides = array<i32>} : memref<8x128xf32, #tpu.memory_space<vmem>>, vector<8x128xf32>,
    return
  }
  func.func @transform_0(%arg0: i32, %arg1: i32) -> (i32, i32) {
    %c1_i32 = arith.constant 1 : i32
    %0 = arith.muli %arg0, %c1_i32 : i32
    %1 = arith.addi %0, %arg1 : i32
    %c0_i32 = arith.constant 0 : i32
    %c0_i32_0 = arith.constant 0 : i32
    return %1, %c0_i32 : i32, i32
  }
  func.func @transform_1(%arg0: i32, %arg1: i32) -> (i32, i32) {
    %c1_i32 = arith.constant 1 : i32
    %0 = arith.muli %arg0, %c1_i32 : i32
    %1 = arith.addi %0, %arg1 : i32
    %c0_i32 = arith.constant 0 : i32
    %c0_i32_0 = arith.constant 0 : i32
    return %1, %c0_i32 : i32, i32
  }
  func.func @transform_2(%arg0: i32, %arg1: i32) -> (i32, i32) {
    %c1_i32 = arith.constant 1 : i32
    %0 = arith.muli %arg0, %c1_i32 : i32
    %1 = arith.addi %0, %arg1 : i32
    %c0_i32 = arith.constant 0 : i32
    %c0_i32_0 = arith.constant 0 : i32
    return %1, %c0_i32 : i32, i32
  }
  func.func @transform_3(%arg0: i32, %arg1: i32) -> (i32, i32) {
    %c0_i32 = arith.constant 0 : i32
    %c0_i32_0 = arith.constant 0 : i32
    return %arg0, %c0_i32 : i32, i32
  }
  func.func @transform_4(%arg0: i32, %arg1: i32) -> (i32, i32) {
    %c0_i32 = arith.constant 0 : i32
    %c0_i32_0 = arith.constant 0 : i32
    return %arg0, %c0_i32 : i32, i32
  }
}

</mosaic_0001>

<bundles_post_ra>
// kernel: tpu_custom_call.1
= control target key start
LH: loop header
LB: loop body
LE: loop exit
PB: predicated region body
PF: predicated region fallthrough
CT: control target
= control target key end

     0   :  { %s1209_s0 = inlined_call_operand.hbm [shape: f32[64,128], index: 0, kind: input, shape index: {}]   ;;  %s1210_s1 = inlined_call_operand.hbm [shape: f32[64,128], index: 1, kind: input, shape index: {}]   ;;  %s1211_s2 = inlined_call_operand.hbm [shape: s8[64,128], index: 2, kind: input, shape index: {}]   ;;  %s1212_s3 = inlined_call_operand.hbm [shape: f32[16,128], index: 3, kind: output, shape index: {0}]   ;;  %s1213_s4 = inlined_call_operand.hbm [shape: f32[16,128], index: 4, kind: output, shape index: {1}]  }
   0x1   :  { %1223 = sst [smem:[#allocation22_spill]] %s1210_s1 }
   0x2   :  { %1224 = sst [smem:[#allocation23_spill]] %s1212_s3 }
   0x3   :  { %10 = vsyncpa [#allocation3], 0 }
   0x4   :  { %12 = vsyncpa [#allocation3 + $0x1], 0 }
   0x5   :  { %13 = vsyncpa [#allocation6], 0 }
   0x6   :  { %15 = vsyncpa [#allocation6 + $0x1], 0 }
   0x7   :  { %16 = vsyncpa [#allocation4], 0 }
   0x8   :  { %18 = vsyncpa [#allocation4 + $0x1], 0 }
   0x9   :  { %19 = vsyncpa [#allocation10], 0 }
   0xa   :  { %21 = vsyncpa [#allocation10 + $0x1], 0  ;;  %s995_s15 = smov 0   ;;  %s997_s16 = smov 0  }
   0xb   :  { %s999_s17 = smov 0   ;;  %s1001_s18 = smov 0  }
   0xc   :  { %s1003_s19 = smov 0   ;;  %s1005_s20 = smov 0  }
   0xd LB: > { %1225 = sst [smem:[#allocation15_spill]] %s946_s15  ;;  %s1026_s21 = sadd.s32 4294967295, %s966_s20   ;;  %s966_s20 = sphi %s1005_s20, %s27_s20   ;;  %s962_s19 = sphi %s1003_s19, %s1251_s19   ;;  %s958_s18 = sphi %s1001_s18, %s1250_s18   ;;  %s954_s17 = sphi %s999_s17, %s1246_s17   ;;  %s950_s16 = sphi %s997_s16, %s1249_s16   ;;  %s946_s15 = sphi %s995_s15, %s1248_s15  }
   0xe   : > { %1226 = sst [smem:[#allocation16_spill]] %s954_s17  ;;  %s637_s22 = sadd.s32 4294967294, %s966_s20  }
   0xf   : > { %1227 = sst [smem:[#allocation17_spill]] %s966_s20  ;;  %s39_s23 = sadd.s32 1, %s962_s19 }
  0x10   : > { %s48_s24 = sadd.s32 1, %s954_s17  ;;  %p41_p0 = scmp.ge.s32.totalorder %s39_s23, 2 }
  0x11   : > { %p55_p1 = scmp.ne.s32.totalorder %s954_s17, %s950_s16  ;;  %p56_p2 = scmp.eq.s32.totalorder %s966_s20, 0 }
  0x12   : > { %p61_p3 = scmp.ne.s32.totalorder %s950_s16, %s946_s15  ;;  %s1253_s23 = smov (%p41_p0, %s39_s23), 0 }
  0x13   : > { %1228 = sst [smem:[#allocation18_spill]] %s1253_s23  ;;  %p1038_p4 = por %p56_p2, %p55_p1 }
  0x14   : > { %p62_p5 = scmp.eq.s32.totalorder %s1026_s21, 0  ;;  %s45_s26 = ssub.s32 %s962_s19, %s1253_s23 }
  0x15   : > { %p141_p6 = scmp.eq.s32.totalorder %s1026_s21, 1  ;;  %p46_p7 = scmp.eq.s32.totalorder %s45_s26, 0 }
  0x16   : > { %p1046_p8 = por %p62_p5, %p61_p3  ;;  %p147_p10 = scmp.eq.s32.totalorder %s637_s22, 1 }
  0x17   : > { %p1050_p9 = por %p141_p6, %p55_p1  ;;  %p639_p12 = scmp.ge.s32.totalorder %s966_s20, 2 }
  0x18   : > { %s1055_s29 = scalar_select %p46_p7, %s954_s17, %s48_s24  }
  0x19   : > { %s1231_s28 = scalar_select %p1050_p9, 1, 0 }
  0x1a   : > { %1233 = sst [smem:[#allocation20_spill]] %s1055_s29  ;;  %p1057_p11 = por %p147_p10, %p61_p3 }
  0x1b   : > { %1232 = sst [smem:[#allocation19_spill]] %s1231_s28  ;;  %p689_p13 = scmp.lt.s32.totalorder %s966_s20, 2 }
  0x1c   : > { %s1234_s30 = scalar_select %p1057_p11, 1, 0 }
  0x1d   : > { %s1064_s5 = sand.u32 1, %s954_s17   ;;  %s660_s7 = sshll.u32 %s962_s19, 5 }
  0x1e   : > { %1235 = sst [smem:[#allocation21_spill]] %s1234_s30  ;;  %s640_s6 = sshll.u32 %s1064_s5, 5 }
  0x1f   : > { %p1070_p0 = pnand %p689_p13, %p1038_p4  ;;  %s216_s9 = sand.u32 1, %s966_s20  }
  0x20   : > { %s1237_s1 = sld [smem:[#allocation22_spill]]  ;;  %s220_s14 = scalar_lea.vmem [#allocation5], %s640_s6 }
  0x21   : > { %s229_s22 = sshll.u32 %s220_s14, 4  ;;  %s217_s24 = scalar_lea.sflag [#allocation6], %s216_s9  ;;  %s230_s22 = int_to_ptr.vmem [resolvable:$true] %s229_s22 }
  0x22   : > { %s968_s25 = smov 128   ;;  %s969_s26 = smov 8  }
  0x23   : > { %p648_p1 = scmp.ge.s32.totalorder %s966_s20, 1  ;;  %p257_p2 = scmp.lt.s32.totalorder %s966_s20, 3 }
  0x24   : > { %s194_s9 = scalar_lea.sflag [#allocation3], %s1064_s5 }
  0x25   : > { %p1082_p3 = pnand %p648_p1, %p257_p2 }
  0x26   : > { %s226_s12 = scalar_lea.hbm %s1237_s1, %s660_s7  ;;  %s197_s1 = scalar_lea.vmem [#allocation2], %s640_s6 }
  0x27   : > { %s227_s13 = sshll.u32 %s226_s12, 4  ;;  %s203_s12 = scalar_lea.hbm %s1209_s0, %s660_s7  ;;  %s228_s13 = int_to_ptr.hbm [resolvable:$true] %s227_s13 }
  0x28   : > { %678 = dma.hbm_to_vmem [thread:$0]  (!%p1070_p0), %s228_s13, 512, %s230_s22, %s217_s24, %s968_s25, %s968_s25, %s969_s26  }
  0x29   : > { %s204_s14 = sshll.u32 %s203_s12, 4  ;;  %s206_s29 = sshll.u32 %s197_s1, 4  ;;  %s205_s14 = int_to_ptr.hbm [resolvable:$true] %s204_s14  ;;  %s207_s29 = int_to_ptr.vmem [resolvable:$true] %s206_s29 }
  0x2a   : > { %675 = dma.hbm_to_vmem [thread:$0]  (!%p1070_p0), %s205_s14, 512, %s207_s29, %s194_s9, %s968_s25, %s968_s25, %s969_s26  }
  0x2b   : > { %s646_s13 = sshll.u32 %s1064_s5, 3  ;;  %s647_s22 = sshll.u32 %s962_s19, 3 }
  0x2c   : > { %s248_s30 = scalar_lea.hbm %s1211_s2, %s647_s22  ;;  %s243_s3 = scalar_lea.vmem [#allocation7], %s646_s13 }
  0x2d   : > { %s250_s15 = sshll.u32 %s248_s30, 4  ;;  %s252_s28 = sshll.u32 %s243_s3, 4  ;;  %s251_s15 = int_to_ptr.hbm [resolvable:$true] %s250_s15  ;;  %s253_s28 = int_to_ptr.vmem [resolvable:$true] %s252_s28 }
  0x2e   : > { %681 = dma.hbm_to_vmem [thread:$0]  (!%p1070_p0), %s251_s15, 128, %s253_s28, %s217_s24  }
  0x2f   : > { %261 = sbr.rel (%p1082_p3) target bundleno = 102 (0x66), region = 32  ;;  %s1102_s1 = sand.u32 (!%p1082_p3), 1, %s950_s16  }
  0x30   : > { %s649_s29 = sshll.u32 (!%p1082_p3), %s1102_s1, 5  ;;  %s264_s5 = scalar_lea.sflag (!%p1082_p3), [#allocation3], %s1102_s1 }
  0x31   : > { %s267_s17 = scalar_lea.vmem (!%p1082_p3), [#allocation2], %s649_s29 }
  0x34   : > { %929 = dma.done.wait (%p1046_p8), %s264_s5, 512  }
  0x35   : > { %931 = vsyncadd (%p1046_p8), %s264_s5, 4294966784  ;;  %s273_s3 = sand.u32 1, %s1026_s21   ;;  %s1111_s20 = scalar_lea.vmem [#allocation5], %s649_s29 }
  0x36   : > { %s274_s15 = scalar_lea.sflag [#allocation6], %s273_s3 }
  0x37   : > { %933 = dma.done.wait (%p1046_p8), %s274_s15, 640  }
  0x38   : > { %935 = vsyncadd (%p1046_p8), %s274_s15, 4294966656  ;;  %s1118_s23 = sshll.u32 %s1102_s1, 3  ;;  %v339_v1 = vld [vmem:[%s267_s17] sm:$0xff]  ;;  %v340_v2 = vld [vmem:[%s267_s17 + $0x8] sm:$0xff]  ;;  %s656_s21 = sshll.u32 %s958_s18, 3 }
  0x39   : > { %s287_s28 = scalar_lea.vmem [#allocation7], %s1118_s23  ;;  %v341_v3 = vld [vmem:[%s267_s17 + $0x10] sm:$0xff]  ;;  %v356_v4 = vadd.f32 1e-07, %v339_v1  ;;  %v368_v5 = vsub.f32 1.0, %v339_v1  ;;  %v342_v8 = vld [vmem:[%s267_s17 + $0x18] sm:$0xff]  ;;  %v396_v19 = vmul.f32 %v339_v1, %v339_v1  ;;  %v397_v28 = vmul.f32 %v340_v2, %v340_v2  ;;  %s1144_s6 = scalar_lea.hbm %s1213_s4, %s656_s21 }
  0x3a   : > { %v347_v0 = vld [vmem:[%s287_s28] sm:$0xff]  ;;  %v357_v9 = vadd.f32 1e-07, %v340_v2  ;;  %v358_v10 = vadd.f32 1e-07, %v341_v3  ;;  %v369_v14 = vsub.f32 1.0, %v340_v2  ;;  %v398_v51 = vmul.f32 %v341_v3, %v341_v3 }
  0x3b   : > { %v348_v6 = vunpack.c.0.s8 %v347_v0  ;;  %v349_v7 = vunpack.c.1.s8 %v347_v0  ;;  %v359_v11 = vadd.f32 1e-07, %v342_v8  ;;  %742 = vlog2.f32 %v356_v4  ;;  %v343_v16 = vld [vmem:[%s1111_s20] sm:$0xff]  ;;  %v344_v22 = vld [vmem:[%s1111_s20 + $0x8] sm:$0xff]  ;;  %v345_v23 = vld [vmem:[%s1111_s20 + $0x10] sm:$0xff]  ;;  %s327_s7 = scalar_lea.vmem [#allocation9], %s1118_s23 }
  0x3c   : > { %v350_v12 = vunpack.c.2.s8 %v347_v0  ;;  %v351_v13 = vunpack.c.3.s8 %v347_v0  ;;  %v370_v15 = vsub.f32 1.0, %v341_v3  ;;  %744 = vlog2.f32 %v357_v9  ;;  %v346_v24 = vld [vmem:[%s1111_s20 + $0x18] sm:$0xff]  ;;  %s1148_s8 = sshll.u32 %s327_s7, 4  ;;  %s478_s24 = sshll.u32 %s1144_s6, 4  ;;  %s477_s8 = int_to_ptr.vmem [resolvable:$true] %s1148_s8  ;;  %s479_s24 = int_to_ptr.hbm [resolvable:$true] %s478_s24 }
  0x3d   : > { %v371_v17 = vsub.f32 1.0, %v342_v8  ;;  %v384_v18 = vadd.f32 1e-07, %v368_v5  ;;  %v1122_v20 = vcvt.s32.f32 %v348_v6  ;;  %v1124_v21 = vcvt.s32.f32 %v349_v7  ;;  %s450_s26 = scalar_lea.sflag [#allocation10], %s1102_s1  ;;  %s862_s10 = sshra.s32 %s479_s24, 4  ;;  %s863_s10 = int_to_ptr.hbm [resolvable:$true] %s862_s10 }
  0x3e   : > { %746 = vlog2.f32 %v358_v10  ;;  %v385_v25 = vadd.f32 1e-07, %v369_v14  ;;  %v386_v26 = vadd.f32 1e-07, %v370_v15  ;;  %v1129_v29 = vcvt.s32.f32 %v350_v12  ;;  %s864_s11 = scalar_lea.hbm %s863_s10, 8  ;;  %s868_s9 = scalar_lea.hbm %s1213_s4, 16 }
  0x3f   : > { %748 = vlog2.f32 %v359_v11  ;;  %v387_v27 = vadd.f32 1e-07, %v371_v17  ;;  %v1131_v30 = vcvt.s32.f32 %v351_v13  ;;  %v404_v31 = vsub.f32 1.0, %v343_v16  ;;  %p865_p4 = scmp.ne.s32.totalorder %s863_s10, %s864_s11  ;;  %p869_p7 = scmp.lt.s32.totalorder %s863_s10, %s1213_s4 }
  0x40   : > { %750 = vlog2.f32 %v384_v18  ;;  %v405_v33 = vsub.f32 1.0, %v344_v22  ;;  %v406_v34 = vsub.f32 1.0, %v345_v23  ;;  %v407_v35 = vsub.f32 1.0, %v346_v24  ;;  %p870_p8 = scmp.lt.s32.totalorder %s868_s9, %s864_s11 }
  0x41   : > { %v743_v32 = vpop.eup %742  ;;  %752 = vlog2.f32 %v385_v25  ;;  %v420_v36 = vsub.f32 1.0, %v1122_v20  ;;  %v421_v37 = vsub.f32 1.0, %v1124_v21  ;;  %v372_v38 = vmul.f32 %v368_v5, %v368_v5  ;;  %p866_p5 = pnand %p865_p4, %p1050_p9 }
  0x42   : > { %754 = vlog2.f32 %v386_v26  ;;  %v745_v39 = vpop.eup %744  ;;  %v361_v40 = vmul.f32 0.6931472, %v743_v32  ;;  %v408_v41 = vmul.f32 %v404_v31, %v404_v31  ;;  %v409_v42 = vmul.f32 %v405_v33, %v405_v33  ;;  %p871_p10 = por %p870_p8, %p869_p7 }
  0x43   : > { %756 = vlog2.f32 %v387_v27  ;;  %v363_v44 = vmul.f32 0.6931472, %v745_v39  ;;  %v373_v45 = vmul.f32 %v369_v14, %v369_v14  ;;  %v374_v46 = vmul.f32 %v370_v15, %v370_v15  ;;  %p867_p6 = pneg %p866_p5 }
  0x44   : > { %v747_v43 = vpop.eup %746  ;;  %v410_v47 = vmul.f32 %v406_v34, %v406_v34  ;;  %v375_v50 = vmul.f32 %v371_v17, %v371_v17  ;;  %v411_v52 = vmul.f32 %v407_v35, %v407_v35  ;;  %v399_v55 = vmul.f32 %v342_v8, %v342_v8 }
  0x45   : > { %v749_v48 = vpop.eup %748  ;;  %v365_v49 = vmul.f32 0.6931472, %v747_v43  ;;  %v422_v56 = vsub.f32 1.0, %v1129_v29  ;;  %v439_v57 = vadd.f32 %v1124_v21, %v1122_v20  ;;  %v376_v59 = vmul.f32 %v372_v38, %v361_v40  ;;  %p872_p13 = pnand %p871_p10, %p867_p6 }
  0x46   : > { %v751_v53 = vpop.eup %750  ;;  %v367_v54 = vmul.f32 0.6931472, %v749_v48  ;;  %v412_v61 = vmul.f32 %v408_v41, %v408_v41  ;;  %v413_v62 = vmul.f32 %v409_v42, %v409_v42  ;;  %v377_v0 = vmul.f32 %v373_v45, %v363_v44 }
  0x47   : > { %v753_v58 = vpop.eup %752  ;;  %v389_v60 = vmul.f32 0.6931472, %v751_v53  ;;  %v414_v2 = vmul.f32 %v410_v47, %v410_v47  ;;  %v440_v3 = vadd.f32 %v439_v57, %v1129_v29  ;;  %v378_v5 = vmul.f32 %v374_v46, %v365_v49 }
  0x48   : > { %v755_v63 = vpop.eup %754  ;;  %v391_v1 = vmul.f32 0.6931472, %v753_v58  ;;  %v415_v8 = vmul.f32 %v411_v52, %v411_v52  ;;  %v379_v9 = vmul.f32 %v375_v50, %v367_v54  ;;  %v380_v13 = vmul.f32 %v376_v59, %v1122_v20 }
  0x49   : > { %v757_v4 = vpop.eup %756  ;;  %v393_v6 = vmul.f32 0.6931472, %v755_v63  ;;  %v400_v7 = vmul.f32 %v396_v19, %v389_v60  ;;  %v441_v12 = vadd.f32 %v440_v3, %v1131_v30  ;;  %v423_v16 = vsub.f32 1.0, %v1131_v30 }
  0x4a   : > { %v395_v10 = vmul.f32 0.6931472, %v757_v4  ;;  %v401_v11 = vmul.f32 %v397_v28, %v391_v1  ;;  %v381_v17 = vmul.f32 %v377_v0, %v1124_v21  ;;  %v382_v22 = vmul.f32 %v378_v5, %v1129_v29 }
  0x4b   : > { %v402_v14 = vmul.f32 %v398_v51, %v393_v6  ;;  %v416_v15 = vmul.f32 %v412_v61, %v400_v7  ;;  %v383_v25 = vmul.f32 %v379_v9, %v1131_v30  ;;  %443 = vst [vmem:[%s327_s7] sm:$0xff] %v441_v12 }
  0x4c   : > { %v403_v18 = vmul.f32 %v399_v55, %v395_v10  ;;  %v417_v19 = vmul.f32 %v413_v62, %v401_v11 }
  0x4d   : > { %v418_v23 = vmul.f32 %v414_v2, %v402_v14  ;;  %v424_v24 = vmul.f32 %v420_v36, %v416_v15 }
  0x4e   : > { %v419_v26 = vmul.f32 %v415_v8, %v403_v18  ;;  %v425_v20 = vmul.f32 %v421_v37, %v417_v19 }
  0x4f   : > { %v426_v27 = vmul.f32 %v422_v56, %v418_v23  ;;  %v428_v28 = vadd.f32 %v424_v24, %v380_v13 }
  0x50   : > { %875 = shalt.err (!%p872_p13)
}
  0x51   : > { %669 = dma.vmem_to_hbm [thread:$0]  (%p1050_p9), %s477_s8, 128, %s479_s24, %s450_s26   ;;  %v427_v21 = vmul.f32 %v423_v16, %v419_v26  ;;  %v429_v29 = vadd.f32 %v425_v20, %v381_v17  ;;  %v430_v30 = vadd.f32 %v426_v27, %v382_v22 }
  0x52   : > { %s1240_s17 = sld [smem:[#allocation23_spill]]  ;;  %s320_s20 = scalar_lea.vmem [#allocation8], %s1118_s23 }
  0x53   : > { %v431_v31 = vadd.f32 %v427_v21, %v383_v25  ;;  %v433_v32 = vadd.f32 %v429_v29, %v428_v28  ;;  %s462_s28 = sshll.u32 %s320_s20, 4  ;;  %s445_s30 = scalar_lea.sflag [#allocation4], %s1102_s1  ;;  %s463_s28 = int_to_ptr.vmem [resolvable:$true] %s462_s28 }
  0x55   : > { %v434_v33 = vadd.f32 %v433_v32, %v430_v30 }
  0x57   : > { %v435_v34 = vadd.f32 %v434_v33, %v431_v31 }
  0x58   : > { %s1241_s3 = smov %s1240_s17  ;;  %s460_s15 = scalar_lea.hbm %s1240_s17, %s656_s21 }
  0x59   : > { %s464_s27 = sshll.u32 %s460_s15, 4  ;;  %437 = vst [vmem:[%s320_s20] sm:$0xff] %v435_v34  ;;  %s896_s21 = scalar_lea.hbm %s1241_s3, 16  ;;  %s465_s27 = int_to_ptr.hbm [resolvable:$true] %s464_s27 }
  0x5a   : > { %s890_s6 = sshra.s32 %s465_s27, 4  ;;  %s891_s6 = int_to_ptr.hbm [resolvable:$true] %s890_s6 }
  0x5b   : > { %s892_s7 = scalar_lea.hbm %s891_s6, 8  ;;  %p897_p3 = scmp.lt.s32.totalorder %s891_s6, %s1241_s3 }
  0x5c   : > { %p893_p0 = scmp.ne.s32.totalorder %s891_s6, %s892_s7  ;;  %p898_p4 = scmp.lt.s32.totalorder %s896_s21, %s892_s7 }
  0x5e   : > { %p894_p1 = pnand %p893_p0, %p1050_p9  ;;  %p899_p5 = por %p898_p4, %p897_p3 }
  0x60   : > { %p895_p2 = pneg %p894_p1 }
  0x62   : > { %p900_p6 = pnand %p899_p5, %p895_p2 }
  0x64   : > { %903 = shalt.err (!%p900_p6)
}
  0x65   : > { %668 = dma.vmem_to_hbm [thread:$0]  (%p1050_p9), %s463_s28, 128, %s465_s27, %s445_s30  }
  0x66 PF: > { %s1242_s1 = sld [smem:[#allocation15_spill]]  ;;  %p683_p7 = pnand %p639_p12, %p1057_p11 }
  0x67   : > { %s1244_s10 = sld [smem:[#allocation17_spill]] }
  0x68   : > { %p684_p8 = pneg %p683_p7 }
  0x6c   : > { %s490_s11 = sand.u32 1, %s1242_s1  }
  0x6d   : > { %s491_s12 = scalar_lea.sflag [#allocation4], %s490_s11 }
  0x6e   : > { %937 = dma.done.wait (%p684_p8), %s491_s12, 128  }
  0x6f   : > { %939 = vsyncadd (%p684_p8), %s491_s12, 4294967168  ;;  %s501_s14 = scalar_lea.sflag [#allocation10], %s490_s11 }
  0x70   : > { %941 = dma.done.wait (%p684_p8), %s501_s14, 128  }
  0x71   : > { %943 = vsyncadd (%p684_p8), %s501_s14, 4294967168  ;;  %s27_s20 = sadd.s32 1, %s1244_s10   ;;  %s1245_s25 = sld [smem:[#allocation16_spill]] }
  0x72   : > { %p24_p10 = scmp.ge.s32.totalorder %s27_s20, 4   ;;  %s1246_s17 = sld [smem:[#allocation20_spill]] }
  0x73   : > { %s1247_s9 = sld [smem:[#allocation18_spill]]  ;;  %s1248_s15 = smov %s950_s16 }
  0x74   : > { %s1250_s18 = smov %s962_s19 }
  0x75   :  { %26 = sbr.rel (!%p24_p10) target bundleno = 13 (0xd), region = 122 }
  0x77   : > { %s1249_s16 = smov %s1245_s25 }
  0x79   : > { %s1251_s19 = smov %s1247_s9 }
  0x7a   :  { %507 = vsyncpa [#allocation3], 1 }
  0x7b   :  { %509 = vsyncpa [#allocation3 + $0x1], 1 }
  0x7c   :  { %510 = vsyncpa [#allocation6], 1 }
  0x7d   :  { %512 = vsyncpa [#allocation6 + $0x1], 1 }
  0x7e   :  { %513 = vsyncpa [#allocation4], 1 }
  0x7f   :  { %515 = vsyncpa [#allocation4 + $0x1], 1 }
  0x80   :  { %516 = vsyncpa [#allocation10], 1 }
  0x81   :  { %518 = vsyncpa [#allocation10 + $0x1], 1 }

</bundles_post_ra>
